<compile_context>
chip_gen: v7x
topology: tpu7x:2x2x1
jax: 0.10.0
libtpu: 0.0.40
codegen_flags: <defaults>
</compile_context>

<pallas_src>
import functools

import numpy as np

import jax
import jax.numpy as jnp
from jax import lax
from jax.experimental import pallas as pl
from jax.experimental.pallas import tpu as pltpu

_LANES = 128        # TPU lane width; row tiles are multiples of this
_LOSS_LANES = 128   # lane-dense per-tile loss partial output


def _round_up(x, m):
    return ((x + m - 1) // m) * m


def _vqvae1d_kernel(x_ref, e_ref, ed_t_ref, dec_t_ref, idx_ref, loss_ref, *,
                    total_rows, block_rows):
    """One block_rows-row tile of the VQ-VAE forward, computed feature-major.

    x_ref:     (TM, D)   f32  input rows (D on lanes for the load only)
    e_ref:     (K, D)    f32  VQ codebook (resident across the grid)
    ed_t_ref:  (D, K)    f32  decoder codebook, pre-transposed (resident)
    dec_t_ref: (D, TM)   f32  decoded output, transposed -> lane-dense stores
    idx_ref:   (1, TM)   i32  argmin indices, lane-dense
    loss_ref:  (1, 128)  f32  per-tile partial sum of ||quantized - x||^2
    """
    x = x_ref[...]                                     # (TM, D)
    e = e_ref[...]                                     # (K, D)
    ed_t = ed_t_ref[...]                               # (D, K)
    tm, d = x.shape
    k = e.shape[0]

    # e . x^T via a trans-B dot_general: output (K, TM) puts the big M axis on lanes.
    xe_t = lax.dot_general(e, x, (((1,), (1,)), ((), ())),
                           preferred_element_type=jnp.float32)          # (K, TM)
    # ||e_k||^2 as a cheap VPU reduction; ||x||^2 omitted (constant per column, does not
    # change the argmin).
    e2 = jnp.sum(e * e, axis=1, keepdims=True)                          # (K, 1)
    scores = e2 - 2.0 * xe_t                                            # (K, TM)

    # First-occurrence argmin over the codebook (sublane) axis.
    min_s = jnp.min(scores, axis=0, keepdims=True)                      # (1, TM)
    row = lax.broadcasted_iota(jnp.int32, scores.shape, 0)              # (K, TM)
    idx = jnp.min(jnp.where(scores <= min_s, row, k),
                  axis=0, keepdims=True)                                # (1, TM)
    idx_ref[...] = idx

    # Decoder embedding lookup as a single one-hot MXU matmul, transposed so the output
    # stays lane-dense: (D, K) @ (K, TM) -> (D, TM).  HIGHEST precision keeps the gathered
    # values exactly equal to the f32 codebook rows.
    onehot_t = (row == idx).astype(jnp.float32)                         # (K, TM)
    dec_t_ref[...] = jnp.dot(ed_t, onehot_t,
                             preferred_element_type=jnp.float32,
                             precision=lax.Precision.HIGHEST)           # (D, TM)

    # ||quantized - x||^2 = min_k(||e_k||^2 - 2 e_k.x) + ||x||^2  -> no diff tensor and no
    # quantized gather needed.  Mask rows added by padding (their x is zero-padded).
    col = pl.program_id(0) * block_rows + lax.broadcasted_iota(jnp.int32, (1, tm), 1)
    valid = (col < total_rows).astype(jnp.float32)                      # (1, TM)
    partial = jnp.sum(min_s * valid) + jnp.sum(x * x)
    loss_ref[...] = partial + jnp.zeros((1, _LOSS_LANES), jnp.float32)


@functools.partial(jax.jit, static_argnames=("block_rows",))
def vqvae1d_forward(inputs, vq_embeddings, dec_embeddings, commitment_cost=0.25,
                    block_rows=2048):
    """inputs: (..., D) float32; codebooks: (K, D) float32.

    block_rows: rows of the flattened input per grid step. 2048 rows is ~4 MiB of live
    VMEM here (safe on v5e/v6e/v7x defaults); raise to 4096-8192 on v6e/v7x if desired.
    """
    k, d = vq_embeddings.shape
    x = inputs.reshape(-1, d).astype(jnp.float32)
    m = x.shape[0]

    tm = min(block_rows, _round_up(m, _LANES))
    m_pad = _round_up(m, tm)
    grid = (m_pad // tm,)
    x_pad = jnp.pad(x, ((0, m_pad - m), (0, 0)))

    e_vq = vq_embeddings.astype(jnp.float32)            # (K, D), resident in VMEM
    ed_t = dec_embeddings.astype(jnp.float32).T         # (D, K), tiny, resident in VMEM

    kernel = functools.partial(_vqvae1d_kernel, total_rows=m, block_rows=tm)

    dec_t, idx, loss_parts = pl.pallas_call(
        kernel,
        grid=grid,
        in_specs=[
            pl.BlockSpec((tm, d), lambda i: (i, 0)),        # x tiles, pipelined over M
            pl.BlockSpec((k, d), lambda i: (0, 0)),         # VQ codebook (constant block)
            pl.BlockSpec((d, k), lambda i: (0, 0)),         # decoder codebook^T (constant)
        ],
        out_specs=[
            pl.BlockSpec((d, tm), lambda i: (0, i)),        # decoded^T, lane-dense stores
            pl.BlockSpec((1, tm), lambda i: (i, 0)),        # indices, lane-dense
            pl.BlockSpec((1, _LOSS_LANES), lambda i: (i, 0)),  # per-tile loss partials
        ],
        out_shape=[
            jax.ShapeDtypeStruct((d, m_pad), jnp.float32),
            jax.ShapeDtypeStruct((grid[0], tm), jnp.int32),
            jax.ShapeDtypeStruct((grid[0], _LOSS_LANES), jnp.float32),
        ],
        compiler_params=pltpu.CompilerParams(
            dimension_semantics=("parallel",),              # megacore sharding on v7x
            vmem_limit_bytes=32 * 1024 * 1024,
        ),
    )(x_pad, e_vq, ed_t)

    # Final decoded transpose + padding strip done wrapper-side in XLA (per review),
    # matching PyTorch shapes: decoded (M, 1, D), encoding_indices (M, 1).
    decoded = dec_t.T[:m].reshape(m, 1, d)
    encoding_indices = idx.reshape(-1)[:m].reshape(m, 1)
    vq_loss = (1.0 + commitment_cost) * jnp.sum(loss_parts[:, 0]) / (m * d)
    # TODO(synk): PyTorch returns int64 indices; int32 used here (values identical for K < 2^31).
    return decoded, vq_loss, encoding_indices


if __name__ == "__main__":
    num_embeddings, embedding_dim = 64, 32   # K, D
    batch, seq = 2, 8                        # flattened to M = 16 rows

    key = jax.random.PRNGKey(0)
    k_in, k_vq, k_dec = jax.random.split(key, 3)
    inputs = jax.random.normal(k_in, (batch, seq, embedding_dim), dtype=jnp.float32)
    # nn.Embedding weights ~ U(-1/K, 1/K), deterministic via PRNGKey(0) splits.
    vq_emb = jax.random.uniform(k_vq, (num_embeddings, embedding_dim), jnp.float32,
                                minval=-1.0 / num_embeddings, maxval=1.0 / num_embeddings)
    dec_emb = jax.random.uniform(k_dec, (num_embeddings, embedding_dim), jnp.float32,
                                 minval=-1.0 / num_embeddings, maxval=1.0 / num_embeddings)

    decoded, vq_loss, encoding_indices = vqvae1d_forward(inputs, vq_emb, dec_emb)
    jax.block_until_ready((decoded, vq_loss, encoding_indices))

    # Lightweight validation against the PyTorch semantics (numpy, f64, tie-tolerant).
    flat = np.asarray(inputs, np.float64).reshape(-1, embedding_dim)
    e_np = np.asarray(vq_emb, np.float64)
    d_np = np.asarray(dec_emb, np.float64)
    m = flat.shape[0]
    dist = ((flat[:, None, :] - e_np[None, :, :]) ** 2).sum(-1)          # (M, K)
    idx_k = np.asarray(encoding_indices).reshape(-1)

    assert encoding_indices.shape == (m, 1) and decoded.shape == (m, 1, embedding_dim)
    assert idx_k.min() >= 0 and idx_k.max() < num_embeddings
    # chosen codebook entry attains the minimum distance (up to MXU precision / ties)
    assert np.all(dist[np.arange(m), idx_k] <= dist.min(axis=1) + 5e-3)
    np.testing.assert_allclose(np.asarray(decoded).reshape(m, embedding_dim),
                               d_np[idx_k], rtol=0, atol=2e-4)
    ref_loss = 1.25 * np.mean((e_np[idx_k] - flat) ** 2)                 # (1+0.25)*mse
    np.testing.assert_allclose(float(vq_loss), ref_loss, rtol=1e-3)

    print("KERNEL_OK")
</pallas_src>

<mosaic_0001>
module attributes {stable_mosaic.version = 11 : i64} {
  func.func @_vqvae1d_kernel(%arg0: i32, %arg1: memref<128x32xf32, #tpu.memory_space<vmem>>, %arg2: memref<64x32xf32, #tpu.memory_space<vmem>>, %arg3: memref<32x64xf32, #tpu.memory_space<vmem>>, %arg4: memref<32x128xf32, #tpu.memory_space<vmem>>, %arg5: memref<1x128xi32, #tpu.memory_space<vmem>>, %arg6: memref<1x128xf32, #tpu.memory_space<vmem>>) attributes {dimension_semantics = [#tpu.dimension_semantics<parallel>], iteration_bounds = array<i64: 1>, scalar_prefetch = 0 : i64, scratch_operands = 0 : i64, tpu.core_type = #tpu.core_type<tc>, window_params = [{transform_indices = @transform_0, window_bounds = array<i64: 128, 32>}, {pipeline_mode = #tpu.pipeline_mode<synchronous>, transform_indices = @transform_1, window_bounds = array<i64: 64, 32>}, {pipeline_mode = #tpu.pipeline_mode<synchronous>, transform_indices = @transform_2, window_bounds = array<i64: 32, 64>}, {transform_indices = @transform_3, window_bounds = array<i64: 32, 128>}, {transform_indices = @transform_4, window_bounds = array<i64: 1, 128>}, {transform_indices = @transform_5, window_bounds = array<i64: 1, 128>}]} {
    %c0 = arith.constant 0 : index
    %c0_0 = arith.constant 0 : index
    %0 = vector.load %arg1[%c0, %c0_0] : memref<128x32xf32, #tpu.memory_space<vmem>>, vector<128x32xf32>
    %c0_1 = arith.constant 0 : index
    %c0_2 = arith.constant 0 : index
    %1 = vector.load %arg2[%c0_1, %c0_2] : memref<64x32xf32, #tpu.memory_space<vmem>>, vector<64x32xf32>
    %c0_3 = arith.constant 0 : index
    %c0_4 = arith.constant 0 : index
    %2 = vector.load %arg3[%c0_3, %c0_4] : memref<32x64xf32, #tpu.memory_space<vmem>>, vector<32x64xf32>
    %cst = arith.constant dense<0.000000e+00> : vector<64x128xf32>
    %3 = tpu.matmul %1, %0, %cst {dimension_numbers = #tpu.dot_dimension_numbers<[1], [1], [0], [0], [0, 0, 1, 0], [], []>} : vector<64x32xf32>, vector<128x32xf32>, vector<64x128xf32> -> vector<64x128xf32>
    %4 = arith.mulf %1, %1 : vector<64x32xf32>
    %cst_5 = arith.constant dense<0.000000e+00> : vector<64xf32>
    %5 = vector.multi_reduction <add>, %4, %cst_5 [1] : vector<64x32xf32> to vector<64xf32>
    %6 = vector.shape_cast %5 : vector<64xf32> to vector<64x1xf32>
    %cst_6 = arith.constant 2.000000e+00 : f32
    %7 = vector.broadcast %cst_6 : f32 to vector<64x128xf32>
    %8 = arith.mulf %7, %3 : vector<64x128xf32>
    %9 = vector.broadcast %6 : vector<64x1xf32> to vector<64x128xf32>
    %10 = arith.subf %9, %8 : vector<64x128xf32>
    %cst_7 = arith.constant dense<0x7F800000> : vector<128xf32>
    %11 = vector.multi_reduction <minimumf>, %10, %cst_7 [0] : vector<64x128xf32> to vector<128xf32>
    %12 = vector.shape_cast %11 : vector<128xf32> to vector<1x128xf32>
    %13 = tpu.iota {dimensions = array<i32: 0>} : vector<64x128xi32>
    %14 = vector.broadcast %12 : vector<1x128xf32> to vector<64x128xf32>
    %15 = arith.cmpf ole, %10, %14 : vector<64x128xf32>
    %c64_i32 = arith.constant 64 : i32
    %16 = vector.broadcast %c64_i32 : i32 to vector<64x128xi32>
    %17 = arith.select %15, %13, %16 : vector<64x128xi1>, vector<64x128xi32>
    %cst_8 = arith.constant dense<2147483647> : vector<128xi32>
    %18 = vector.multi_reduction <minsi>, %17, %cst_8 [0] : vector<64x128xi32> to vector<128xi32>
    %19 = vector.shape_cast %18 : vector<128xi32> to vector<1x128xi32>
    %c0_9 = arith.constant 0 : index
    %c0_10 = arith.constant 0 : index
    %20 = vector.load %arg5[%c0_9, %c0_10] : memref<1x128xi32, #tpu.memory_space<vmem>>, vector<1x128xi32>
    tpu.vector_store %arg5[%c0_9, %c0_10], %19 {strides = array<i32>} : memref<1x128xi32, #tpu.memory_space<vmem>>, vector<1x128xi32>,
    %21 = vector.broadcast %19 : vector<1x128xi32> to vector<64x128xi32>
    %22 = arith.cmpi eq, %13, %21 : vector<64x128xi32>
    %23 = arith.extui %22 : vector<64x128xi1> to vector<64x128xi32>
    %24 = arith.sitofp %23 : vector<64x128xi32> to vector<64x128xf32>
    %cst_11 = arith.constant dense<0.000000e+00> : vector<32x128xf32>
    %25 = tpu.matmul %2, %24, %cst_11 {dimension_numbers = #tpu.dot_dimension_numbers<[1], [0], [0], [1], [0, 0, 1, 1], [], []>, precision = #tpu.contract_precision<fp32>} : vector<32x64xf32>, vector<64x128xf32>, vector<32x128xf32> -> vector<32x128xf32>
    %c0_12 = arith.constant 0 : index
    %c0_13 = arith.constant 0 : index
    %26 = vector.load %arg4[%c0_12, %c0_13] : memref<32x128xf32, #tpu.memory_space<vmem>>, vector<32x128xf32>
    tpu.vector_store %arg4[%c0_12, %c0_13], %25 {strides = array<i32>} : memref<32x128xf32, #tpu.memory_space<vmem>>, vector<32x128xf32>,
    %c128_i32 = arith.constant 128 : i32
    %27 = arith.muli %arg0, %c128_i32 : i32
    %28 = tpu.iota {dimensions = array<i32: 1>} : vector<1x128xi32>
    %29 = vector.broadcast %27 : i32 to vector<1x128xi32>
    %30 = arith.addi %29, %28 : vector<1x128xi32>
    %c16_i32 = arith.constant 16 : i32
    %31 = vector.broadcast %c16_i32 : i32 to vector<1x128xi32>
    %32 = arith.cmpi slt, %30, %31 : vector<1x128xi32>
    %33 = arith.extui %32 : vector<1x128xi1> to vector<1x128xi32>
    %34 = arith.sitofp %33 : vector<1x128xi32> to vector<1x128xf32>
    %35 = arith.mulf %12, %34 : vector<1x128xf32>
    %36 = vector.shape_cast %35 : vector<1x128xf32> to vector<1x1x128xf32>
    %cst_14 = arith.constant dense<0.000000e+00> : vector<1xf32>
    %37 = vector.multi_reduction <add>, %36, %cst_14 [1, 2] : vector<1x1x128xf32> to vector<1xf32>
    %38 = vector.shape_cast %37 : vector<1xf32> to vector<1x1x1xf32>
    %39 = vector.extract %38[0, 0, 0] : f32 from vector<1x1x1xf32>
    %40 = arith.mulf %0, %0 : vector<128x32xf32>
    %41 = vector.shape_cast %40 : vector<128x32xf32> to vector<1x128x32xf32>
    %cst_15 = arith.constant dense<0.000000e+00> : vector<1xf32>
    %42 = vector.multi_reduction <add>, %41, %cst_15 [1, 2] : vector<1x128x32xf32> to vector<1xf32>
    %43 = vector.shape_cast %42 : vector<1xf32> to vector<1x1x1xf32>
    %44 = vector.extract %43[0, 0, 0] : f32 from vector<1x1x1xf32>
    %45 = arith.addf %39, %44 : f32
    %cst_16 = arith.constant 0.000000e+00 : f32
    %46 = vector.broadcast %cst_16 : f32 to vector<1x128xf32>
    %47 = vector.broadcast %45 : f32 to vector<1x128xf32>
    %48 = arith.addf %47, %46 : vector<1x128xf32>
    %c0_17 = arith.constant 0 : index
    %c0_18 = arith.constant 0 : index
    %49 = vector.load %arg6[%c0_17, %c0_18] : memref<1x128xf32, #tpu.memory_space<vmem>>, vector<1x128xf32>
    tpu.vector_store %arg6[%c0_17, %c0_18], %48 {strides = array<i32>} : memref<1x128xf32, #tpu.memory_space<vmem>>, vector<1x128xf32>,
    return
  }
  func.func @transform_0(%arg0: i32) -> (i32, i32) {
    %c0_i32 = arith.constant 0 : i32
    %c0_i32_0 = arith.constant 0 : i32
    return %arg0, %c0_i32 : i32, i32
  }
  func.func @transform_1(%arg0: i32) -> (i32, i32) {
    %c0_i32 = arith.constant 0 : i32
    %c0_i32_0 = arith.constant 0 : i32
    %c0_i32_1 = arith.constant 0 : i32
    return %c0_i32, %c0_i32_0 : i32, i32
  }
  func.func @transform_2(%arg0: i32) -> (i32, i32) {
    %c0_i32 = arith.constant 0 : i32
    %c0_i32_0 = arith.constant 0 : i32
    %c0_i32_1 = arith.constant 0 : i32
    return %c0_i32, %c0_i32_0 : i32, i32
  }
  func.func @transform_3(%arg0: i32) -> (i32, i32) {
    %c0_i32 = arith.constant 0 : i32
    %c0_i32_0 = arith.constant 0 : i32
    return %c0_i32, %arg0 : i32, i32
  }
  func.func @transform_4(%arg0: i32) -> (i32, i32) {
    %c0_i32 = arith.constant 0 : i32
    %c0_i32_0 = arith.constant 0 : i32
    return %arg0, %c0_i32 : i32, i32
  }
  func.func @transform_5(%arg0: i32) -> (i32, i32) {
    %c0_i32 = arith.constant 0 : i32
    %c0_i32_0 = arith.constant 0 : i32
    return %arg0, %c0_i32 : i32, i32
  }
}

</mosaic_0001>

<bundles_post_ra>
// kernel: vqvae1d_forward.1
= control target key start
LH: loop header
LB: loop body
LE: loop exit
PB: predicated region body
PF: predicated region fallthrough
CT: control target
= control target key end

     0   :  { %vm45_vm0 = vcmask 261120   ;;  %vm357_vm2 = vcmask 523264   ;;  %vm1049_vm4 = vcmask 1040384   ;;  %s2155_s0 = inlined_call_operand.vmem [shape: f32[128,32], index: 0, kind: input, shape index: {}]   ;;  %s2156_s1 = inlined_call_operand.vmem [shape: f32[64,32], index: 1, kind: input, shape index: {}]   ;;  %s2157_s2 = inlined_call_operand.vmem [shape: f32[32,64], index: 2, kind: input, shape index: {}]   ;;  %s2158_s4 = inlined_call_operand.vmem [shape: s32[1,128], index: 4, kind: output, shape index: {1}]   ;;  %s2159_s5 = inlined_call_operand.vmem [shape: f32[1,128], index: 5, kind: output, shape index: {2}]   ;;  %s2160_s3 = inlined_call_operand.vmem [shape: f32[32,128], index: 3, kind: output, shape index: {0}]  }
   0x1   :  { %v17_v0 = vld [vmem:[%s2155_s0] sm:$0xff]  ;;  %v18_v1 = vld [vmem:[%s2155_s0 + $0x8] sm:$0xff]  ;;  %v19_v2 = vld [vmem:[%s2155_s0 + $0x10] sm:$0xff] }
   0x2   :  { %v1461_v3 = vpack.c.bf16 %v18_v1, %v17_v0  ;;  %vm1674_vm1 = vmpackc.low %vm45_vm0, %vm45_vm0  ;;  %v1060_v5 = vmul.f32 %v17_v0, %v17_v0  ;;  %v1061_v6 = vmul.f32 %v18_v1, %v18_v1  ;;  %v1062_v7 = vmul.f32 %v19_v2, %v19_v2  ;;  %v20_v8 = vld [vmem:[%s2155_s0 + $0x18] sm:$0xff]  ;;  %v21_v11 = vld [vmem:[%s2155_s0 + $0x20] sm:$0xff] }
   0x3   :  { %v1467_v9 = vpack.c.bf16 %v20_v8, %v19_v2  ;;  %v1063_v10 = vmul.f32 %v20_v8, %v20_v8  ;;  %v1064_v15 = vmul.f32 %v21_v11, %v21_v11  ;;  %v22_v17 = vld [vmem:[%s2155_s0 + $0x28] sm:$0xff]  ;;  %v33_v20 = vld [vmem:[%s2156_s1] sm:$0xff]  ;;  %v23_v22 = vld [vmem:[%s2155_s0 + $0x30] sm:$0xff] }
   0x4   :  { %1463 = vmatprep.subr.msk.bf16.mxu0 %vm1674_vm1, %v1461_v3  ;;  %v1076_v12 = vsel %vm45_vm0, %v1060_v5, 0.0  ;;  %v1077_v13 = vsel %vm45_vm0, %v1061_v6, 0.0  ;;  %v1079_v14 = vsel %vm45_vm0, %v1062_v7, 0.0  ;;  %v1065_v19 = vmul.f32 %v22_v17, %v22_v17  ;;  %1317 = vmatprep.mubr.msk.f32.mxu0 %vm45_vm0, %v33_v20  ;;  %v24_v26 = vld [vmem:[%s2155_s0 + $0x38] sm:$0xff]  ;;  %v1712_v30 = vld [vmem:[%s2156_s1 + $0x8] sm:$0xff]  ;;  %v1717_v31 = vld [vmem:[%s2156_s1 + $0x10] sm:$0xff] }
   0x5   :  { %v1078_v16 = vadd.f32 %v1077_v13, %v1076_v12  ;;  %1466 = vmatpush3.bf16.xpose.msk.msra.mxu0 %vm1674_vm1, %v1461_v3  ;;  %v1081_v18 = vsel %vm45_vm0, %v1063_v10, 0.0  ;;  %v1083_v23 = vsel %vm45_vm0, %v1064_v15, 0.0  ;;  %v1066_v24 = vmul.f32 %v23_v22, %v23_v22  ;;  %v25_v33 = vld [vmem:[%s2155_s0 + $0x40] sm:$0xff]  ;;  %v1725_v35 = vld [vmem:[%s2156_s1 + $0x18] sm:$0xff]  ;;  %v26_v42 = vld [vmem:[%s2155_s0 + $0x48] sm:$0xff] }
   0x6   :  { %1469 = vmatprep.subr.msk.bf16.mxu0 %vm1674_vm1, %v1467_v9  ;;  %v1473_v27 = vpack.c.bf16 %v22_v17, %v21_v11  ;;  %v1085_v28 = vsel %vm45_vm0, %v1065_v19, 0.0  ;;  %v1067_v29 = vmul.f32 %v24_v26, %v24_v26  ;;  %v223_v34 = vmul.f32 %v33_v20, %v33_v20  ;;  %v37_v47 = vld [vmem:[%s2156_s1 + $0x20] sm:$0xff]  ;;  %v38_v49 = vld [vmem:[%s2156_s1 + $0x28] sm:$0xff]  ;;  %v39_v58 = vld [vmem:[%s2156_s1 + $0x30] sm:$0xff] }
   0x7   :  { %v1080_v21 = vadd.f32 %v1079_v14, %v1078_v16  ;;  %v225_v36 = vmul.f32 %v1717_v31, %v1717_v31  ;;  %v224_v37 = vmul.f32 %v1712_v30, %v1712_v30  ;;  %v1087_v38 = vsel %vm45_vm0, %v1066_v24, 0.0  ;;  %v40_v60 = vld [vmem:[%s2156_s1 + $0x38] sm:$0xff]  ;;  %v27_v6 = vld [vmem:[%s2155_s0 + $0x50] sm:$0xff]  ;;  %v30_v10 = vld [vmem:[%s2155_s0 + $0x68] sm:$0xff] }
   0x8   :  { %v1068_v39 = vmul.f32 %v25_v33, %v25_v33  ;;  %v226_v40 = vmul.f32 %v1725_v35, %v1725_v35  ;;  %v231_v43 = vsel %vm45_vm0, %v223_v34, 0.0  ;;  %v1089_v45 = vsel %vm45_vm0, %v1067_v29, 0.0  ;;  %v28_v7 = vld [vmem:[%s2155_s0 + $0x58] sm:$0xff]  ;;  %v31_v12 = vld [vmem:[%s2155_s0 + $0x70] sm:$0xff] }
   0x9   :  { %v1082_v25 = vadd.f32 %v1081_v18, %v1080_v21  ;;  %v237_v44 = vsel %vm45_vm0, %v225_v36, 0.0  ;;  %v1069_v46 = vmul.f32 %v26_v42, %v26_v42  ;;  %232 = vadd.xlane.f32.xlu0 %v231_v43  ;;  %v234_v50 = vsel %vm45_vm0, %v224_v37, 0.0  ;;  %v32_v13 = vld [vmem:[%s2155_s0 + $0x78] sm:$0xff]  ;;  %v43_v37 = vld [vmem:[%s2157_s2 + $0x10] sm:$0xff] }
   0xa   :  { %238 = vadd.xlane.f32.xlu1 %v237_v44  ;;  %v227_v51 = vmul.f32 %v37_v47, %v37_v47  ;;  %v1091_v52 = vsel %vm45_vm0, %v1068_v39, 0.0  ;;  %v240_v53 = vsel %vm45_vm0, %v226_v40, 0.0  ;;  %v228_v54 = vmul.f32 %v38_v49, %v38_v49 }
   0xb   :  { %v1084_v32 = vadd.f32 %v1083_v23, %v1082_v25  ;;  %v1479_v56 = vpack.c.bf16 %v24_v26, %v23_v22  ;;  %v1093_v57 = vsel %vm45_vm0, %v1069_v46, 0.0  ;;  %v229_v62 = vmul.f32 %v39_v58, %v39_v58 }
   0xc   :  { %v243_v61 = vsel %vm45_vm0, %v227_v51, 0.0  ;;  %v246_v63 = vsel %vm45_vm0, %v228_v54, 0.0  ;;  %v230_v0 = vmul.f32 %v40_v60, %v40_v60  ;;  %v1485_v5 = vpack.c.bf16 %v26_v42, %v25_v33  ;;  %v42_v33 = vld [vmem:[%s2157_s2 + $0x8] sm:$0xff] }
   0xd   :  { %1472 = vmatpush3.bf16.xpose.msk.msra.mxu0 %vm1674_vm1, %v1467_v9  ;;  %v1086_v41 = vadd.f32 %v1085_v28, %v1084_v32  ;;  %235 = vadd.xlane.f32.xlu0 %v234_v50  ;;  %v249_v2 = vsel %vm45_vm0, %v229_v62, 0.0  ;;  %v1491_v8 = vpack.c.bf16 %v28_v7, %v27_v6  ;;  %v29_v9 = vld [vmem:[%s2155_s0 + $0x60] sm:$0xff]  ;;  %v1503_v14 = vpack.c.bf16 %v32_v13, %v31_v12 }
   0xe   :  { %1475 = vmatprep.subr.msk.bf16.mxu0 %vm1674_vm1, %v1473_v27  ;;  %241 = vadd.xlane.f32.xlu1 %v240_v53  ;;  %v252_v3 = vsel %vm45_vm0, %v230_v0, 0.0  ;;  %v1497_v11 = vpack.c.bf16 %v30_v10, %v29_v9  ;;  %v1070_v15 = vmul.f32 %v27_v6, %v27_v6  ;;  %v1071_v4 = vmul.f32 %v28_v7, %v28_v7  ;;  %v41_v32 = vld [vmem:[%s2157_s2] sm:$0xff] }
   0xf   :  { %v1088_v48 = vadd.f32 %v1087_v38, %v1086_v41  ;;  %v1072_v17 = vmul.f32 %v29_v9, %v29_v9  ;;  %v1073_v21 = vmul.f32 %v30_v10, %v30_v10  ;;  %v1074_v24 = vmul.f32 %v31_v12, %v31_v12  ;;  %v44_v38 = vld [vmem:[%s2157_s2 + $0x18] sm:$0xff] }
  0x10   :  { %v1095_v16 = vsel %vm45_vm0, %v1070_v15, 0.0  ;;  %v1097_v19 = vsel %vm45_vm0, %v1071_v4, 0.0  ;;  %v359_v34 = vsel %vm357_vm2, %v41_v32, 0  ;;  %v1837_v39 = vsel %vm357_vm2, %v43_v37, 0 }
  0x11   :  { %v1090_v55 = vadd.f32 %v1089_v45, %v1088_v48  ;;  %244 = vadd.xlane.f32.xlu0 %v243_v61  ;;  %v1099_v22 = vsel %vm45_vm0, %v1072_v17, 0.0  ;;  %v1101_v25 = vsel %vm45_vm0, %v1073_v21, 0.0  ;;  %v1103_v28 = vsel %vm45_vm0, %v1074_v24, 0.0 }
  0x12   :  { %247 = vadd.xlane.f32.xlu1 %v246_v63  ;;  %v1828_v36 = vand.u32 4294901760, %v359_v34  ;;  %v1839_v40 = vsel %vm357_vm2, %v44_v38, 0  ;;  %v1631_v38 = vmov 0.0  }
  0x13   :  { %v1092_v59 = vadd.f32 %v1091_v52, %v1090_v55 }
  0x14   :  { %1367 = vmatprep.mubr.f32.mxu1 %v1828_v36  ;;  %v1842_v15 = vsub.f32 %v359_v34, %v1828_v36 }
  0x15   :  { %1478 = vmatpush3.bf16.xpose.msk.msra.mxu0 %vm1674_vm1, %v1473_v27  ;;  %v1094_v1 = vadd.f32 %v1093_v57, %v1092_v59  ;;  %250 = vadd.xlane.f32.xlu0 %v249_v2  ;;  %v1075_v27 = vmul.f32 %v32_v13, %v32_v13 }
  0x16   :  { %1481 = vmatprep.subr.msk.bf16.mxu0 %vm1674_vm1, %v1479_v56  ;;  %253 = vadd.xlane.f32.xlu1 %v252_v3 }
  0x17   :  { %v1096_v18 = vadd.f32 %v1095_v16, %v1094_v1  ;;  %v445_v16 = vand.u32 4294901760, %v1842_v15 }
  0x19   :  { %v1098_v20 = vadd.f32 %v1097_v19, %v1096_v18  ;;  %v446_v18 = vsub.f32 %v1842_v15, %v445_v16  ;;  %v284_v19 = vlaneseq }
  0x1b   :  { %v1100_v23 = vadd.f32 %v1099_v22, %v1098_v20  ;;  %v447_v21 = vand.u32 4294901760, %v446_v18  ;;  %v1042_v24 = vand.u32 127, %v284_v19 }
  0x1d   :  { %1484 = vmatpush3.bf16.xpose.msk.msra.mxu0 %vm1674_vm1, %v1479_v56  ;;  %v1102_v26 = vadd.f32 %v1101_v25, %v1100_v23  ;;  %v1848_v25 = vshrl.u32 %v284_v19, 7  ;;  %vm1045_vm3 = vcmp.lt.s32.totalorder %v1042_v24, 16 }
  0x1e   :  { %1487 = vmatprep.subr.msk.bf16.mxu0 %vm1674_vm1, %v1485_v5 }
  0x1f   :  { %v1104_v29 = vadd.f32 %v1103_v28, %v1102_v26  ;;  %v1851_v28 = vadd.s32 8, %v1848_v25  ;;  %v1863_v32 = vadd.s32 40, %v1848_v25  ;;  %v1866_v34 = vadd.s32 48, %v1848_v25 }
  0x20   :  { %v1869_v37 = vadd.s32 56, %v1848_v25 }
  0x25   :  { %1490 = vmatpush3.bf16.xpose.msk.msra.mxu0 %vm1674_vm1, %v1485_v5 }
  0x26   :  { %1493 = vmatprep.subr.msk.bf16.mxu0 %vm1674_vm1, %v1491_v8 }
  0x2d   :  { %1496 = vmatpush3.bf16.xpose.msk.msra.mxu0 %vm1674_vm1, %v1491_v8 }
  0x2e   :  { %1499 = vmatprep.subr.msk.bf16.mxu0 %vm1674_vm1, %v1497_v11 }
  0x35   :  { %1502 = vmatpush3.bf16.xpose.msk.msra.mxu0 %vm1674_vm1, %v1497_v11 }
  0x36   :  { %1505 = vmatprep.subr.msk.bf16.mxu0 %vm1674_vm1, %v1503_v14 }
  0x3d   :  { %1508 = vmatpush3.bf16.xpose.msk.msra.mxu0 %vm1674_vm1, %v1503_v14 }
  0x44   :  { %1318 = vmatmul.mubr.msk.f32.vlgmr.msra.gmra.mrb[0].mxu0 %vm45_vm0, %v1712_v30  ;;  %v1105_v30 = vsel %vm45_vm0, %v1075_v27, 0.0 }
  0x45   :  { %1320 = vmatprep.mubr.msk.f32.mxu0 %vm45_vm0, %v1717_v31  ;;  %v1106_v31 = vadd.f32 %v1105_v30, %v1104_v29  ;;  %v1854_v29 = vadd.s32 16, %v1848_v25  ;;  %v1857_v30 = vadd.s32 24, %v1848_v25 }
  0x47   :  { %1107 = vadd.xlane.f32.xlu1 %v1106_v31  ;;  %v1860_v31 = vadd.s32 32, %v1848_v25 }
  0x48   :  { %1321 = vmatmul.mubr.msk.f32.gmra.mrb[2].mxu0 %vm45_vm0, %v1725_v35  ;;  %v1826_v35 = vsel %vm357_vm2, %v42_v33, 0 }
  0x49   :  { %1323 = vmatprep.mubr.msk.f32.mxu0 %vm45_vm0, %v37_v47 }
  0x4c   :  { %1324 = vmatmul.mubr.msk.f32.gmra.mrb[4].mxu0 %vm45_vm0, %v38_v49 }
  0x4d   :  { %1326 = vmatprep.mubr.msk.f32.mxu0 %vm45_vm0, %v39_v58 }
  0x50   :  { %1327 = vmatmul.mubr.msk.f32.gmra.mrb[6].mxu0 %vm45_vm0, %v40_v60 }
  0x51   :  { %1345 = vmatprep.mubr.f32.mxu0 %v447_v21 }
  0x96   :  { %v233_v42 = vpop.xlane.xlu0 %232 }
  0x97   :  { %v239_v41 = vpop.xlane.xlu1 %238 }
  0x9a   :  { %v236_v46 = vpop.xlane.xlu0 %235 }
  0x9b   :  { %v242_v44 = vpop.xlane.xlu1 %241 }
  0x9e   :  { %v245_v51 = vpop.xlane.xlu0 %244 }
  0x9f   :  { %v248_v49 = vpop.xlane.xlu1 %247 }
  0xa2   :  { %v251_v5 = vpop.xlane.xlu0 %250 }
  0xa3   :  { %v254_v0 = vpop.xlane.xlu1 %253 }
 0x117   :  { %v1319_v43 = vpop.f32.mrb[0].mxu0 }
 0x118   :  { %v184_v45 = vpop.f32.mrb[1].mxu0  ;;  %v256_v50 = vmul.f32 2.0, %v1319_v43 }
 0x119   :  { %v255_v52 = vmul.f32 2.0, %v184_v45 }
 0x11a   :  { %v264_v57 = vsub.f32 %v236_v46, %v256_v50 }
 0x11b   :  { %v1322_v47 = vpop.f32.mrb[2].mxu0  ;;  %v263_v60 = vsub.f32 %v233_v42, %v255_v52 }
 0x11c   :  { %v194_v48 = vpop.f32.mrb[3].mxu0  ;;  %v258_v58 = vmul.f32 2.0, %v1322_v47 }
 0x11d   :  { %v257_v61 = vmul.f32 2.0, %v194_v48 }
 0x11e   :  { %v266_v8 = vsub.f32 %v242_v44, %v258_v58 }
 0x11f   :  { %v1325_v53 = vpop.f32.mrb[4].mxu0  ;;  %v265_v10 = vsub.f32 %v239_v41, %v257_v61  ;;  %v1188_v41 = vsel %vm1045_vm3, 1.0, %v1631_v38 }
 0x120   :  { %v260_v54 = vmul.f32 2.0, %v1325_v53  ;;  %v204_v55 = vpop.f32.mrb[5].mxu0 }
 0x121   :  { %v259_v56 = vmul.f32 2.0, %v204_v55 }
 0x122   :  { %v268_v59 = vsub.f32 %v248_v49, %v260_v54 }
 0x123   :  { %v267_v62 = vsub.f32 %v245_v51, %v259_v56  ;;  %v1328_v63 = vpop.f32.mrb[6].mxu0 }
 0x124   :  { %v272_v1 = vmin.f32 %v264_v57, %v268_v59  ;;  %v262_v2 = vmul.f32 2.0, %v1328_v63  ;;  %v214_v3 = vpop.f32.mrb[7].mxu0 }
 0x125   :  { %v271_v6 = vmin.f32 %v263_v60, %v267_v62  ;;  %v261_v7 = vmul.f32 2.0, %v214_v3  ;;  %v1889_v3 = vand.u32 4294901760, %v1837_v39 }
 0x126   :  { %v270_v9 = vsub.f32 %v254_v0, %v262_v2  ;;  %v1882_v0 = vand.u32 4294901760, %v1826_v35 }
 0x127   :  { %v275_v11 = vmin.f32 %v271_v6, %v272_v1  ;;  %v269_v12 = vsub.f32 %v251_v5, %v261_v7  ;;  %v1892_v5 = vand.u32 4294901760, %v1839_v40  ;;  %v1914_v7 = vsub.f32 %v1837_v39, %v1889_v3 }
 0x128   :  { %v274_v13 = vmin.f32 %v266_v8, %v270_v9  ;;  %v1886_v2 = vsub.f32 %v1826_v35, %v1882_v0 }
 0x129   :  { %v273_v14 = vmin.f32 %v265_v10, %v269_v12 }
 0x12b   :  { %v276_v4 = vmin.f32 %v273_v14, %v274_v13 }
 0x12d   :  { %v277_v17 = vmin.f32 %v275_v11, %v276_v4 }
 0x12f   :  { %v278_v20 = vrot.slane %v277_v17, 4 }
 0x131   :  { %v279_v22 = vmin.f32 %v277_v17, %v278_v20 }
 0x133   :  { %v280_v23 = vrot.slane %v279_v22, 2 }
 0x135   :  { %v281_v26 = vmin.f32 %v279_v22, %v280_v23  ;;  %v1963_v23 = vsub.f32 %v1839_v40, %v1892_v5 }
 0x137   :  { %v282_v27 = vrot.slane %v281_v26, 1 }
 0x139   :  { %v283_v33 = vmin.f32 %v281_v26, %v282_v27  ;;  %v455_v27 = vand.u32 4294901760, %v1886_v2 }
 0x13b   :  { %vm293_vm5 = vcmp.le.f32.partialorder %v263_v60, %v283_v33  ;;  %vm294_vm6 = vcmp.le.f32.partialorder %v264_v57, %v283_v33  ;;  %vm295_vm7 = vcmp.le.f32.partialorder %v265_v10, %v283_v33  ;;  %vm296_vm8 = vcmp.le.f32.partialorder %v266_v8, %v283_v33 }
 0x13c   :  { %vm297_vm9 = vcmp.le.f32.partialorder %v267_v62, %v283_v33  ;;  %vm298_vm10 = vcmp.le.f32.partialorder %v268_v59, %v283_v33  ;;  %vm299_vm11 = vcmp.le.f32.partialorder %v269_v12, %v283_v33  ;;  %vm300_vm12 = vcmp.le.f32.partialorder %v270_v9, %v283_v33 }
 0x13d   :  { %v301_v42 = vsel %vm293_vm5, %v1848_v25, 64  ;;  %v302_v43 = vsel %vm294_vm6, %v1851_v28, 64  ;;  %v303_v44 = vsel %vm295_vm7, %v1854_v29, 64  ;;  %v304_v45 = vsel %vm296_vm8, %v1857_v30, 64 }
 0x13e   :  { %v305_v46 = vsel %vm297_vm9, %v1860_v31, 64  ;;  %v306_v47 = vsel %vm298_vm10, %v1863_v32, 64  ;;  %v307_v48 = vsel %vm299_vm11, %v1866_v34, 64  ;;  %v308_v49 = vsel %vm300_vm12, %v1869_v37, 64 }
 0x13f   :  { %vm309_vm13 = vcmp.lt.s32.totalorder %v301_v42, %v305_v46  ;;  %vm311_vm14 = vcmp.lt.s32.totalorder %v302_v43, %v306_v47  ;;  %vm313_vm15 = vcmp.lt.s32.totalorder %v303_v44, %v307_v48  ;;  %vm315_vm0 = vcmp.lt.s32.totalorder %v304_v45, %v308_v49 }
 0x140   :  { %v310_v50 = vsel %vm309_vm13, %v301_v42, %v305_v46  ;;  %v312_v51 = vsel %vm311_vm14, %v302_v43, %v306_v47  ;;  %v314_v52 = vsel %vm313_vm15, %v303_v44, %v307_v48  ;;  %v316_v53 = vsel %vm315_vm0, %v304_v45, %v308_v49 }
 0x141   :  { %vm317_vm1 = vcmp.lt.s32.totalorder %v310_v50, %v312_v51  ;;  %vm319_vm2 = vcmp.lt.s32.totalorder %v314_v52, %v316_v53  ;;  %v1048_v54 = vmul.f32 %v1188_v41, %v283_v33  ;;  %v1632_v9 = vmov 1.0|1.0  }
 0x142   :  { %v318_v55 = vsel %vm317_vm1, %v310_v50, %v312_v51  ;;  %v320_v56 = vsel %vm319_vm2, %v314_v52, %v316_v53  ;;  %v475_v44 = vand.u32 4294901760, %v1963_v23  ;;  %v456_v45 = vsub.f32 %v1886_v2, %v455_v27 }
 0x143   :  { %vm321_vm3 = vcmp.lt.s32.totalorder %v318_v55, %v320_v56  ;;  %v1050_v57 = vsel %vm1049_vm4, %v1048_v54, 0.0 }
 0x144   :  { %v322_v58 = vsel %vm321_vm3, %v318_v55, %v320_v56  ;;  %1051 = vadd.xlane.f32.xlu0 %v1050_v57  ;;  %v457_v55 = vand.u32 4294901760, %v456_v45  ;;  %v476_v56 = vsub.f32 %v1963_v23, %v475_v44 }
 0x145   :  { %v323_v59 = vrot.slane %v322_v58, 4 }
 0x147   :  { %vm324_vm5 = vcmp.lt.s32.totalorder %v322_v58, %v323_v59 }
 0x148   :  { %v325_v60 = vsel %vm324_vm5, %v322_v58, %v323_v59 }
 0x149   :  { %v326_v61 = vrot.slane %v325_v60, 2 }
 0x14b   :  { %vm327_vm6 = vcmp.lt.s32.totalorder %v325_v60, %v326_v61 }
 0x14c   :  { %v328_v62 = vsel %vm327_vm6, %v325_v60, %v326_v61 }
 0x14d   :  { %v329_v63 = vrot.slane %v328_v62, 1 }
 0x14f   :  { %vm330_vm7 = vcmp.lt.s32.totalorder %v328_v62, %v329_v63 }
 0x150   :  { %v331_v1 = vsel %vm330_vm7, %v328_v62, %v329_v63  ;;  %v477_v63 = vand.u32 4294901760, %v476_v56 }
 0x151   :  { %332 = vst [vmem:[%s2158_s4] sm:$0x1] %v331_v1  ;;  %vm339_vm4 = vcmp.eq.s32.totalorder %v1866_v34, %v331_v1  ;;  %vm333_vm8 = vcmp.eq.s32.totalorder %v1848_v25, %v331_v1  ;;  %vm334_vm9 = vcmp.eq.s32.totalorder %v1851_v28, %v331_v1  ;;  %vm335_vm10 = vcmp.eq.s32.totalorder %v1854_v29, %v331_v1 }
 0x152   :  { %vm1905_vm11 = vmpackc.low %vm334_vm9, %vm333_vm8  ;;  %vm336_vm12 = vcmp.eq.s32.totalorder %v1857_v30, %v331_v1  ;;  %v1158_v6 = vsel %vm335_vm10, 1.0, %v1631_v38  ;;  %vm337_vm13 = vcmp.eq.s32.totalorder %v1860_v31, %v331_v1  ;;  %v1162_v8 = vsel %vm339_vm4, 1.0, %v1631_v38 }
 0x153   :  { %1510 = vmatprep.subr.msk.bf16.mxu0 %vm1905_vm11, %v1632_v9  ;;  %v1159_v10 = vsel %vm336_vm12, 1.0, %v1631_v38  ;;  %v1923_v11 = vsub.f32 %v1158_v6, %v1158_v6  ;;  %vm338_vm14 = vcmp.eq.s32.totalorder %v1863_v32, %v331_v1  ;;  %vm1929_vm15 = vmpackc.low %vm336_vm12, %vm335_vm10  ;;  %v1160_v13 = vsel %vm337_vm13, 1.0, %v1631_v38 }
 0x154   :  { %1512 = vmatpush3.bf16.msk.msra.mxu0 %vm1905_vm11, %v1632_v9  ;;  %v1933_v12 = vsub.f32 %v1159_v10, %v1159_v10  ;;  %v1161_v14 = vsel %vm338_vm14, 1.0, %v1631_v38  ;;  %vm340_vm0 = vcmp.eq.s32.totalorder %v1869_v37, %v331_v1  ;;  %v1945_v4 = vsub.f32 %v1160_v13, %v1160_v13  ;;  %vm1979_vm1 = vmpackc.low %vm338_vm14, %vm337_vm13 }
 0x155   :  { %1514 = vmatprep.subr.msk.bf16.mxu0 %vm1929_vm15, %v1632_v9  ;;  %v1947_v17 = vsub.f32 %v1161_v14, %v1161_v14  ;;  %v1163_v18 = vsel %vm340_vm0, 1.0, %v1631_v38  ;;  %v1156_v19 = vsel %vm333_vm8, 1.0, %v1631_v38  ;;  %v1157_v20 = vsel %vm334_vm9, 1.0, %v1631_v38  ;;  %vm2018_vm2 = vmpackc.low %vm340_vm0, %vm339_vm4 }
 0x156   :  { %v1958_v21 = vsub.f32 %v1156_v19, %v1156_v19  ;;  %v500_v22 = vand.u32 4294901760, %v1923_v11  ;;  %v1965_v24 = vsub.f32 %v1157_v20, %v1157_v20  ;;  %v507_v26 = vand.u32 4294901760, %v1933_v12 }
 0x157   :  { %v465_v25 = vand.u32 4294901760, %v1914_v7  ;;  %v1970_v29 = vsub.f32 %v1162_v8, %v1162_v8  ;;  %v1983_v28 = vsub.f32 %v1163_v18, %v1163_v18  ;;  %v514_v33 = vand.u32 4294901760, %v1945_v4 }
 0x158   :  { %1516 = vmatpush3.bf16.msk.msra.mxu0 %vm1929_vm15, %v1632_v9  ;;  %v486_v30 = vand.u32 4294901760, %v1958_v21  ;;  %v493_v38 = vand.u32 4294901760, %v1965_v24  ;;  %v501_v31 = vsub.f32 %v1923_v11, %v500_v22  ;;  %v508_v32 = vsub.f32 %v1933_v12, %v507_v26 }
 0x159   :  { %1518 = vmatprep.subr.msk.bf16.mxu0 %vm1979_vm1, %v1632_v9  ;;  %v521_v41 = vand.u32 4294901760, %v1947_v17  ;;  %v466_v46 = vsub.f32 %v1914_v7, %v465_v25  ;;  %v515_v49 = vsub.f32 %v1945_v4, %v514_v33  ;;  %v528_v50 = vand.u32 4294901760, %v1970_v29 }
 0x15a   :  { %v487_v42 = vsub.f32 %v1958_v21, %v486_v30  ;;  %v494_v43 = vsub.f32 %v1965_v24, %v493_v38  ;;  %v535_v51 = vand.u32 4294901760, %v1983_v28  ;;  %v502_v52 = vand.u32 4294901760, %v501_v31 }
 0x15b   :  { %v509_v37 = vand.u32 4294901760, %v508_v32  ;;  %v522_v53 = vsub.f32 %v1947_v17, %v521_v41  ;;  %v529_v57 = vsub.f32 %v1970_v29, %v528_v50  ;;  %v467_v58 = vand.u32 4294901760, %v466_v46 }
 0x15c   :  { %1520 = vmatpush3.bf16.msk.msra.mxu0 %vm1979_vm1, %v1632_v9  ;;  %v488_v48 = vand.u32 4294901760, %v487_v42  ;;  %v495_v34 = vand.u32 4294901760, %v494_v43  ;;  %v516_v60 = vand.u32 4294901760, %v515_v49  ;;  %v536_v62 = vsub.f32 %v1983_v28, %v535_v51 }
 0x15d   :  { %1522 = vmatprep.subr.msk.bf16.mxu0 %vm2018_vm2, %v1632_v9  ;;  %v1529_v59 = vpack.c.bf16 %v509_v37, %v502_v52  ;;  %v523_v61 = vand.u32 4294901760, %v522_v53  ;;  %v530_v6 = vand.u32 4294901760, %v529_v57  ;;  %v1541_v13 = vpack.c.bf16 %v1965_v24, %v1958_v21 }
 0x15e   :  { %v1525_v54 = vpack.c.bf16 %v495_v34, %v488_v48  ;;  %v537_v8 = vand.u32 4294901760, %v536_v62  ;;  %v1545_v14 = vpack.c.bf16 %v1933_v12, %v1923_v11  ;;  %v1549_v18 = vpack.c.bf16 %v1947_v17, %v1945_v4 }
 0x15f   :  { %v1533_v1 = vpack.c.bf16 %v523_v61, %v516_v60  ;;  %v1553_v19 = vpack.c.bf16 %v1983_v28, %v1970_v29  ;;  %v1573_v20 = vpack.c.bf16 %v493_v38, %v486_v30 }
 0x160   :  { %1524 = vmatpush3.bf16.msk.msra.mxu0 %vm2018_vm2, %v1632_v9  ;;  %1526 = vmatprep.subr.bf16.mxu1 %v1525_v54  ;;  %v1537_v10 = vpack.c.bf16 %v537_v8, %v530_v6 }
 0x161   :  { %1528 = vmatpush3.bf16.msra.mxu1 %v1525_v54 }
 0x162   :  { %1530 = vmatprep.subr.bf16.mxu1 %v1529_v59 }
 0x163   :  { %1346 = vmatmul.mubr.f32.vlgmr.msra.gmra.mrb[8].mxu0 %v457_v55 }
 0x164   :  { %1348 = vmatprep.mubr.f32.mxu0 %v467_v58 }
 0x165   :  { %1532 = vmatpush3.bf16.msra.mxu1 %v1529_v59 }
 0x166   :  { %1534 = vmatprep.subr.bf16.mxu1 %v1533_v1 }
 0x167   :  { %1349 = vmatmul.mubr.f32.gmra.mrb[10].mxu0 %v477_v63 }
 0x169   :  { %1536 = vmatpush3.bf16.msra.mxu1 %v1533_v1 }
 0x16a   :  { %1538 = vmatprep.subr.bf16.mxu1 %v1537_v10 }
 0x16d   :  { %1540 = vmatpush3.bf16.msra.mxu1 %v1537_v10 }
 0x16e   :  { %1542 = vmatprep.subr.bf16.mxu1 %v1541_v13 }
 0x170   :  { %1368 = vmatmul.mubr.f32.vlgmr.msra.gmra.mrb[0].mxu1 %v1882_v0 }
 0x171   :  { %1544 = vmatpush3.bf16.msra.mxu1 %v1541_v13  ;;  %1370 = vmatprep.mubr.f32.mxu1 %v1889_v3 }
 0x172   :  { %1546 = vmatprep.subr.bf16.mxu1 %v1545_v14 }
 0x174   :  { %1371 = vmatmul.mubr.f32.gmra.mrb[2].mxu1 %v1892_v5 }
 0x175   :  { %1548 = vmatpush3.bf16.msra.mxu1 %v1545_v14  ;;  %1389 = vmatprep.mubr.f32.mxu1 %v1842_v15  ;;  %v1577_v15 = vpack.c.bf16 %v507_v26, %v500_v22 }
 0x176   :  { %1550 = vmatprep.subr.bf16.mxu1 %v1549_v18 }
 0x179   :  { %1552 = vmatpush3.bf16.msra.mxu1 %v1549_v18 }
 0x17a   :  { %1554 = vmatprep.subr.bf16.mxu1 %v1553_v19 }
 0x17d   :  { %1556 = vmatpush3.bf16.msra.mxu1 %v1553_v19 }
 0x17e   :  { %1558 = vmatprep.subr.msk.bf16.mxu1 %vm1905_vm11, %v1632_v9 }
 0x180   :  { %1390 = vmatmul.mubr.f32.vlgmr.msra.gmra.mrb[0].mxu1 %v1886_v2  ;;  %v1585_v2 = vpack.c.bf16 %v535_v51, %v528_v50 }
 0x181   :  { %1560 = vmatpush3.bf16.msk.msra.mxu1 %vm1905_vm11, %v1632_v9  ;;  %1392 = vmatprep.mubr.f32.mxu1 %v1914_v7 }
 0x182   :  { %1562 = vmatprep.subr.msk.bf16.mxu1 %vm1929_vm15, %v1632_v9 }
 0x184   :  { %1393 = vmatmul.mubr.f32.gmra.mrb[2].mxu1 %v1963_v23 }
 0x185   :  { %1564 = vmatpush3.bf16.msk.msra.mxu1 %vm1929_vm15, %v1632_v9  ;;  %1411 = vmatprep.mubr.f32.mxu1 %v445_v16  ;;  %v1581_v16 = vpack.c.bf16 %v521_v41, %v514_v33 }
 0x186   :  { %1566 = vmatprep.subr.msk.bf16.mxu1 %vm1979_vm1, %v1632_v9 }
 0x189   :  { %1568 = vmatpush3.bf16.msk.msra.mxu1 %vm1979_vm1, %v1632_v9 }
 0x18a   :  { %1570 = vmatprep.subr.msk.bf16.mxu1 %vm2018_vm2, %v1632_v9 }
 0x18d   :  { %1572 = vmatpush3.bf16.msk.msra.mxu1 %vm2018_vm2, %v1632_v9 }
 0x18e   :  { %1574 = vmatprep.subr.bf16.mxu1 %v1573_v20 }
 0x190   :  { %1412 = vmatmul.mubr.f32.vlgmr.msra.gmra.mrb[0].mxu1 %v455_v27 }
 0x191   :  { %1576 = vmatpush3.bf16.msra.mxu1 %v1573_v20  ;;  %1414 = vmatprep.mubr.f32.mxu1 %v465_v25 }
 0x192   :  { %1578 = vmatprep.subr.bf16.mxu1 %v1577_v15 }
 0x194   :  { %1415 = vmatmul.mubr.f32.gmra.mrb[2].mxu1 %v475_v44 }
 0x195   :  { %1580 = vmatpush3.bf16.msra.mxu1 %v1577_v15  ;;  %1433 = vmatprep.mubr.f32.mxu1 %v1828_v36 }
 0x196   :  { %1582 = vmatprep.subr.bf16.mxu1 %v1581_v16 }
 0x199   :  { %1584 = vmatpush3.bf16.msra.mxu1 %v1581_v16 }
 0x19a   :  { %1586 = vmatprep.subr.bf16.mxu1 %v1585_v2 }
 0x19d   :  { %1588 = vmatpush3.bf16.msra.mxu1 %v1585_v2 }
 0x19e   :  { %1590 = vmatprep.subr.msk.bf16.mxu1 %vm1905_vm11, %v1632_v9 }
 0x1a0   :  { %1434 = vmatmul.mubr.f32.vlgmr.msra.gmra.mrb[0].mxu1 %v1882_v0 }
 0x1a1   :  { %1592 = vmatpush3.bf16.msk.msra.mxu1 %vm1905_vm11, %v1632_v9  ;;  %1436 = vmatprep.mubr.f32.mxu1 %v1889_v3 }
 0x1a2   :  { %1594 = vmatprep.subr.msk.bf16.mxu1 %vm1929_vm15, %v1632_v9 }
 0x1a4   :  { %1437 = vmatmul.mubr.f32.gmra.mrb[2].mxu1 %v1892_v5 }
 0x1a5   :  { %1596 = vmatpush3.bf16.msk.msra.mxu1 %vm1929_vm15, %v1632_v9  ;;  %1455 = vmatprep.mubr.f32.mxu1 %v1828_v36  ;;  %v1108_v36 = vpop.xlane.xlu1 %1107 }
 0x1a6   :  { %1598 = vmatprep.subr.msk.bf16.mxu1 %vm1979_vm1, %v1632_v9  ;;  %v1109_v35 = vrot.slane %v1108_v36, 4 }
 0x1a8   :  { %v1110_v7 = vadd.f32 %v1109_v35, %v1108_v36 }
 0x1a9   :  { %1600 = vmatpush3.bf16.msk.msra.mxu1 %vm1979_vm1, %v1632_v9 }
 0x1aa   :  { %1602 = vmatprep.subr.msk.bf16.mxu1 %vm2018_vm2, %v1632_v9  ;;  %v1111_v11 = vrot.slane %v1110_v7, 2 }
 0x1ac   :  { %v1112_v4 = vadd.f32 %v1111_v11, %v1110_v7 }
 0x1ad   :  { %1604 = vmatpush3.bf16.msk.msra.mxu1 %vm2018_vm2, %v1632_v9 }
 0x1ae   :  { %v1113_v22 = vrot.slane %v1112_v4, 1 }
 0x1b0   :  { %1456 = vmatmul.mubr.f32.vlgmr.msra.gmra.mrb[0].mxu1 %v1882_v0  ;;  %v1114_v26 = vadd.f32 %v1113_v22, %v1112_v4 }
 0x1b1   :  { %1458 = vmatprep.mubr.f32.mxu1 %v1889_v3 }
 0x1b4   :  { %1459 = vmatmul.mubr.f32.gmra.mrb[2].mxu1 %v1892_v5 }
 0x1d1   :  { %v1052_v39 = vpop.xlane.xlu0 %1051 }
 0x1d2   :  { %v1053_v12 = vrot.slane %v1052_v39, 4 }
 0x1d4   :  { %v1054_v17 = vadd.f32 %v1053_v12, %v1052_v39 }
 0x1d6   :  { %v1055_v21 = vrot.slane %v1054_v17, 2 }
 0x1d8   :  { %v1056_v23 = vadd.f32 %v1055_v21, %v1054_v17 }
 0x1da   :  { %v1057_v24 = vrot.slane %v1056_v23, 1 }
 0x1dc   :  { %v1058_v9 = vadd.f32 %v1057_v24, %v1056_v23 }
 0x1de   :  { %1625 = vpush %v1058_v9 }
 0x1df   :  { %1627 = vpush %v1114_v26 }
 0x20f   :  { %s1626_s4 = spop %1625 }
 0x210   :  { %s1628_s23 = spop %1627 }
 0x211   :  { %s1116_s24 = sadd.f32 %s1628_s23, %s1626_s4 }
 0x213   :  { %v1117_v0 = vstv %s1116_s24 }
 0x214   :  { %1119 = vst [vmem:[%s2159_s5] sm:$0x1] %v1117_v0 }
 0x236   :  { %v1347_v3 = vpop.f32.mrb[8].mxu0 }
 0x237   :  { %v449_v5 = vpop.f32.mrb[9].mxu0 }
 0x23a   :  { %v1350_v27 = vpop.f32.mrb[10].mxu0 }
 0x23b   :  { %v469_v25 = vpop.f32.mrb[11].mxu0 }
 0x283   :  { %v1457_v29 = vpop.f32.mrb[0].mxu1 }
 0x284   :  { %v1605_v40 = vadd.f32 %v1457_v29, %v1347_v3  ;;  %v1014_v28 = vpop.f32.mrb[1].mxu1 }
 0x285   :  { %v1606_v30 = vadd.f32 %v1014_v28, %v449_v5 }
 0x286   :  { %1037 = vst [vmem:[%s2160_s3 + $0x8] sm:$0xff] %v1605_v40 }
 0x287   :  { %1036 = vst [vmem:[%s2160_s3] sm:$0xff] %v1606_v30  ;;  %v1460_v33 = vpop.f32.mrb[2].mxu1 }
 0x288   :  { %v1607_v38 = vadd.f32 %v1460_v33, %v1350_v27  ;;  %v1026_v31 = vpop.f32.mrb[3].mxu1 }
 0x289   :  { %v1608_v32 = vadd.f32 %v1026_v31, %v469_v25 }
 0x28a   :  { %1039 = vst [vmem:[%s2160_s3 + $0x18] sm:$0xff] %v1607_v38 }
 0x28b   :  { %1038 = vst [vmem:[%s2160_s3 + $0x10] sm:$0xff] %v1608_v32 }

</bundles_post_ra>
